<compile_context>
chip_gen: v5e
topology: v5e:2x2
jax: 0.10.0
libtpu: 0.0.40
codegen_flags: <defaults>
</compile_context>

<pallas_src>
import jax
import jax.numpy as jnp
from jax.experimental import pallas as pl
from jax.experimental.pallas import tpu as pltpu


def _round_up(v, m):
    return (v + m - 1) // m * m


def _pick_tile(dim, cap, base):
    """Largest multiple of `base` that divides `dim` and is <= min(cap, dim).

    `dim` and `cap` are multiples of `base`, so this terminates (worst case
    returns `base`)."""
    t = min(cap, dim)
    while dim % t:
        t -= base
    return t


# -----------------------------------------------------------------------------
# Stage 1a: average the ensemble weights over the model axis; all M models are
# read in a single (M, tk1, tn1) block per (K, N) tile — pure DMA + VPU, no
# accumulator revisits.  Used when that block fits the VMEM budget.
# -----------------------------------------------------------------------------
def _avg_w_collapsed_kernel(w_ref, w_mean_ref):
    inv_m = 1.0 / w_ref.shape[0]
    w_mean_ref[...] = (
        jnp.sum(w_ref[...].astype(jnp.float32), axis=0) * inv_m
    ).astype(w_mean_ref.dtype)


# -----------------------------------------------------------------------------
# Stage 1b: same reduction, but tiled over the model axis (innermost grid dim)
# with an f32 VMEM accumulator; used when M is too large for one block.
# -----------------------------------------------------------------------------
def _avg_w_tiled_kernel(w_ref, w_mean_ref, acc_ref):
    m = pl.program_id(2)

    @pl.when(m == 0)
    def _init():
        acc_ref[...] = jnp.zeros_like(acc_ref)

    acc_ref[...] += w_ref[0].astype(jnp.float32)

    @pl.when(m == pl.num_programs(2) - 1)
    def _finalize():
        w_mean_ref[...] = (
            acc_ref[...] * (1.0 / pl.num_programs(2))
        ).astype(w_mean_ref.dtype)


# -----------------------------------------------------------------------------
# Stage 2: one lane-dense tiled matmul (MXU, bf16 inputs, f32 accumulator).
# The bias mean is folded into the k == 0 accumulator init, so finalize is a
# pure cast/store.  Grid = (B tiles, D_out tiles, D_in tiles), contraction
# axis innermost.
# -----------------------------------------------------------------------------
def _matmul_bias_kernel(x_ref, w_ref, b_ref, o_ref, acc_ref):
    k = pl.program_id(2)

    @pl.when(k == 0)
    def _init():
        b_mean = jnp.mean(b_ref[...].astype(jnp.float32), axis=0, keepdims=True)
        acc_ref[...] = jnp.broadcast_to(b_mean, acc_ref.shape)

    acc_ref[...] += jnp.dot(
        x_ref[...], w_ref[...], preferred_element_type=jnp.float32
    )

    @pl.when(k == pl.num_programs(2) - 1)
    def _finalize():
        o_ref[...] = acc_ref[...].astype(o_ref.dtype)


def mean_module_forward(x, weights, biases, *, compute_dtype=jnp.bfloat16):
    """mean_m (x @ weights[m] + biases[m]) via two Pallas TPU kernels."""
    B, D_in = x.shape
    M, _, D_out = weights.shape
    out_dtype = x.dtype
    w_bytes = jnp.dtype(weights.dtype).itemsize

    # ---------------- stage-2 (matmul) tiling --------------------------------
    B_pad = _round_up(B, 8)
    K_pad = _round_up(D_in, 128)
    N_pad = _round_up(D_out, 128)
    tm = _pick_tile(B_pad, cap=256, base=8)      # 256-row LHS fills v6e/v7x MXU
    tn = _pick_tile(N_pad, cap=512, base=128)
    tk = _pick_tile(K_pad, cap=1024, base=128)
    # v7x has 2 TensorCores: keep >= 2 parallel output tiles when possible.
    while (B_pad // tm) * (N_pad // tn) < 2 and tn % 256 == 0:
        tn //= 2

    # ---------------- stage-1 (weight-averaging) tiling ----------------------
    # Reads the UNPADDED weights (never materialize a padded copy of the full
    # M-model tensor).  Block dims are either (8,128)-aligned tiles or the full
    # array dims (allowed); the K tile is bounded by a fixed VMEM budget so the
    # footprint does not scale with D_in.
    w_block_budget = 6 * 1024 * 1024   # bytes for one stage-1 weight block
    tn1 = _pick_tile(D_out, cap=512, base=128) if D_out % 128 == 0 else D_out

    def _k1_tile(models_per_block):
        if D_in % 8 != 0:
            return D_in                           # full-dim block (ragged D_in)
        cap = (w_block_budget // max(1, models_per_block * tn1 * w_bytes)) // 8 * 8
        return _pick_tile(D_in, cap=min(1024, max(8, cap)), base=8)

    tk1 = _k1_tile(M)
    collapse_m = M * tk1 * tn1 * w_bytes <= 2 * w_block_budget
    if not collapse_m:
        tk1 = _k1_tile(1)

    # ---------------- stage 1: average weights over the model axis -----------
    if collapse_m:
        w_mean = pl.pallas_call(
            _avg_w_collapsed_kernel,
            out_shape=jax.ShapeDtypeStruct((D_in, D_out), compute_dtype),
            grid=(D_in // tk1, D_out // tn1),
            in_specs=[pl.BlockSpec((M, tk1, tn1), lambda ki, ni: (0, ki, ni))],
            out_specs=pl.BlockSpec((tk1, tn1), lambda ki, ni: (ki, ni)),
            compiler_params=pltpu.CompilerParams(
                dimension_semantics=("parallel", "parallel"),
            ),
        )(weights)
    else:
        # TODO(synk): if both D_in and D_out are ragged AND huge, the
        # (1, D_in, D_out) block may still be large; no tiled path exists
        # without a padded copy of the weights.
        w_mean = pl.pallas_call(
            _avg_w_tiled_kernel,
            out_shape=jax.ShapeDtypeStruct((D_in, D_out), compute_dtype),
            grid=(D_in // tk1, D_out // tn1, M),
            in_specs=[pl.BlockSpec((1, tk1, tn1), lambda ki, ni, m: (m, ki, ni))],
            out_specs=pl.BlockSpec((tk1, tn1), lambda ki, ni, m: (ki, ni)),
            scratch_shapes=[pltpu.VMEM((tk1, tn1), jnp.float32)],
            compiler_params=pltpu.CompilerParams(
                dimension_semantics=("parallel", "parallel", "arbitrary"),
            ),
        )(weights)

    # ---------------- padding (cheap: never the full M-model tensor) ---------
    if (K_pad, N_pad) != (D_in, D_out):
        w_mean = jnp.pad(w_mean, ((0, K_pad - D_in), (0, N_pad - D_out)))
    x_c = x.astype(compute_dtype)
    if (B_pad, K_pad) != (B, D_in):
        x_c = jnp.pad(x_c, ((0, B_pad - B), (0, K_pad - D_in)))
    b_p = biases if N_pad == D_out else jnp.pad(
        biases, ((0, 0), (0, N_pad - D_out))
    )

    # ---------------- stage 2: single lane-dense matmul + bias ---------------
    out_p = pl.pallas_call(
        _matmul_bias_kernel,
        out_shape=jax.ShapeDtypeStruct((B_pad, N_pad), out_dtype),
        grid=(B_pad // tm, N_pad // tn, K_pad // tk),
        in_specs=[
            pl.BlockSpec((tm, tk), lambda i, j, k: (i, k)),
            pl.BlockSpec((tk, tn), lambda i, j, k: (k, j)),
            pl.BlockSpec((M, tn), lambda i, j, k: (0, j)),
        ],
        out_specs=pl.BlockSpec((tm, tn), lambda i, j, k: (i, j)),
        scratch_shapes=[pltpu.VMEM((tm, tn), jnp.float32)],
        compiler_params=pltpu.CompilerParams(
            dimension_semantics=("parallel", "parallel", "arbitrary"),
        ),
    )(x_c, w_mean, b_p)

    if (B_pad, N_pad) != (B, D_out):
        out_p = out_p[:B, :D_out]
    return out_p


if __name__ == "__main__":
    # Small, deterministic shapes: batch=8, hidden=32, 3 ensemble members.
    B, D_in, D_out, M = 8, 32, 32, 3

    key = jax.random.PRNGKey(0)
    kx, kw, kb = jax.random.split(key, 3)
    x = jax.random.normal(kx, (B, D_in), dtype=jnp.float32)
    weights = jax.random.normal(kw, (M, D_in, D_out), dtype=jnp.float32) * 0.1
    biases = jax.random.normal(kb, (M, D_out), dtype=jnp.float32) * 0.1

    out = mean_module_forward(x, weights, biases)
    out = jax.block_until_ready(out)

    # Pure-JAX reference: stack per-model outputs, mean over the model dim
    # (exactly the MeanModule forward).
    ref = jnp.mean(
        jnp.stack([x @ weights[m] + biases[m] for m in range(M)], axis=0),
        axis=0,
    )
    assert out.shape == (B, D_out)
    assert out.dtype == x.dtype
    # bf16 MXU inputs (with f32 accumulation) plus the x@mean(W) algebraic
    # rewrite change rounding vs the serial f32 ensemble; loose tolerance
    # covers that.
    assert jnp.allclose(out, ref, atol=3e-2, rtol=3e-2), float(
        jnp.max(jnp.abs(out - ref))
    )

    print("KERNEL_OK")
</pallas_src>

<mosaic_0001>
module attributes {stable_mosaic.version = 11 : i64} {
  func.func @_avg_w_collapsed_kernel(%arg0: i32, %arg1: i32, %arg2: memref<3x32x32xf32, #tpu.memory_space<vmem>>, %arg3: memref<32x32xbf16, #tpu.memory_space<vmem>>) attributes {dimension_semantics = [#tpu.dimension_semantics<parallel>, #tpu.dimension_semantics<parallel>], iteration_bounds = array<i64: 1, 1>, scalar_prefetch = 0 : i64, scratch_operands = 0 : i64, tpu.core_type = #tpu.core_type<tc>, window_params = [{transform_indices = @transform_0, window_bounds = array<i64: 3, 32, 32>}, {transform_indices = @transform_1, window_bounds = array<i64: 32, 32>}]} {
    %c0 = arith.constant 0 : index
    %c0_0 = arith.constant 0 : index
    %c0_1 = arith.constant 0 : index
    %0 = vector.load %arg2[%c0, %c0_0, %c0_1] : memref<3x32x32xf32, #tpu.memory_space<vmem>>, vector<3x32x32xf32>
    %cst = arith.constant dense<0.000000e+00> : vector<32x32xf32>
    %1 = vector.multi_reduction <add>, %0, %cst [0] : vector<3x32x32xf32> to vector<32x32xf32>
    %cst_2 = arith.constant 0.333333343 : f32
    %2 = vector.broadcast %cst_2 : f32 to vector<32x32xf32>
    %3 = arith.mulf %1, %2 : vector<32x32xf32>
    %4 = arith.truncf %3 : vector<32x32xf32> to vector<32x32xbf16>
    %c0_3 = arith.constant 0 : index
    %c0_4 = arith.constant 0 : index
    %5 = vector.load %arg3[%c0_3, %c0_4] : memref<32x32xbf16, #tpu.memory_space<vmem>>, vector<32x32xbf16>
    tpu.vector_store %arg3[%c0_3, %c0_4], %4 {strides = array<i32>} : memref<32x32xbf16, #tpu.memory_space<vmem>>, vector<32x32xbf16>,
    return
  }
  func.func @transform_0(%arg0: i32, %arg1: i32) -> (i32, i32, i32) {
    %c0_i32 = arith.constant 0 : i32
    %c0_i32_0 = arith.constant 0 : i32
    return %c0_i32, %arg0, %arg1 : i32, i32, i32
  }
  func.func @transform_1(%arg0: i32, %arg1: i32) -> (i32, i32) {
    %c0_i32 = arith.constant 0 : i32
    return %arg0, %arg1 : i32, i32
  }
}

</mosaic_0001>

<bundles_post_ra>
// kernel: tpu_custom_call.1
= control target key start
LH: loop header
LB: loop body
LE: loop exit
PB: predicated region body
PF: predicated region fallthrough
CT: control target
= control target key end

     0   :  { %6 = vsyncpa [#allocation3], 0  ;;  %s186_s0 = inlined_call_operand.hbm [shape: f32[3,32,32], index: 0, kind: input, shape index: {}]   ;;  %s187_s1 = inlined_call_operand.hbm [shape: bf16[32,32], index: 1, kind: output, shape index: {}]  }
   0x1   :  { %7 = vsyncpa [#allocation4], 0  ;;  %s12_s8 = sshll.u32 %s186_s0, 4  ;;  %s148_s9 = smov [#allocation2]   ;;  %s13_s8 = int_to_ptr.hbm [resolvable:$true] %s12_s8 }
   0x2   :  { %s14_s10 = sshll.u32 %s148_s9, 4  ;;  %s149_s11 = smov 128   ;;  %s15_s10 = int_to_ptr.vmem [resolvable:$true] %s14_s10 }
   0x3   :  { %s150_s12 = smov 8  }
   0x4   :  { %20 = dma.hbm_to_vmem [thread:$0]  %s13_s8, 1536, %s15_s10, [#allocation3], %s149_s11, %s149_s11, %s150_s12  }
   0x5   :  { %144 = dma.done.wait [#allocation3], 1536  }
   0x6   :  { %145 = vsyncadd [#allocation3], 4294965760  ;;  %vm37_vm0 = vcmask 261120   ;;  %v25_v0 = vld [vmem:[#allocation2] sm:$0xff]  ;;  %v26_v6 = vld [vmem:[#allocation2 + $0x8] sm:$0xff]  ;;  %vm66_vm1 = vcmask 257024  }
   0x7   :  { %v29_v1 = vld [vmem:[#allocation2 + $0x20] sm:$0xff]  ;;  %v38_v3 = vsel %vm37_vm0, %v25_v0, 0.0  ;;  %v30_v7 = vld [vmem:[#allocation2 + $0x28] sm:$0xff]  ;;  %v43_v10 = vsel %vm37_vm0, %v26_v6, 0.0  ;;  %v27_v13 = vld [vmem:[#allocation2 + $0x10] sm:$0xff]  ;;  %s151_s0 = smov [#allocation5]  }
   0x8   :  { %v33_v2 = vld [vmem:[#allocation2 + $0x40] sm:$0xff]  ;;  %v39_v4 = vsel %vm37_vm0, %v29_v1, 0.0  ;;  %v34_v8 = vld [vmem:[#allocation2 + $0x48] sm:$0xff]  ;;  %v44_v11 = vsel %vm37_vm0, %v30_v7, 0.0  ;;  %v31_v14 = vld [vmem:[#allocation2 + $0x30] sm:$0xff]  ;;  %v48_v17 = vsel %vm37_vm0, %v27_v13, 0.0 }
   0x9   :  { %v41_v5 = vsel %vm37_vm0, %v33_v2, 0.0  ;;  %v40_v9 = vadd.f32 %v39_v4, %v38_v3  ;;  %v46_v12 = vsel %vm37_vm0, %v34_v8, 0.0  ;;  %v35_v15 = vld [vmem:[#allocation2 + $0x50] sm:$0xff]  ;;  %v45_v16 = vadd.f32 %v44_v11, %v43_v10  ;;  %v28_v20 = vld [vmem:[#allocation2 + $0x18] sm:$0xff]  ;;  %s75_s13 = sshll.u32 %s151_s0, 4  ;;  %s77_s16 = sshll.u32 %s187_s1, 4  ;;  %s76_s13 = int_to_ptr.vmem [resolvable:$true] %s75_s13  ;;  %s78_s16 = int_to_ptr.hbm [resolvable:$true] %s77_s16 }
   0xa   :  { %v49_v18 = vsel %vm37_vm0, %v31_v14, 0.0  ;;  %v51_v19 = vsel %vm37_vm0, %v35_v15, 0.0  ;;  %v32_v21 = vld [vmem:[#allocation2 + $0x38] sm:$0xff]  ;;  %v53_v25 = vsel %vm37_vm0, %v28_v20, 0.0  ;;  %s152_s17 = smov 64   ;;  %s153_s18 = smov 4  }
   0xb   :  { %v36_v22 = vld [vmem:[#allocation2 + $0x58] sm:$0xff]  ;;  %v42_v23 = vadd.f32 %v41_v5, %v40_v9  ;;  %v50_v24 = vadd.f32 %v49_v18, %v48_v17  ;;  %v54_v26 = vsel %vm37_vm0, %v32_v21, 0.0  ;;  %v47_v27 = vadd.f32 %v46_v12, %v45_v16 }
   0xc   :  { %v55_v28 = vadd.f32 %v54_v26, %v53_v25  ;;  %v56_v29 = vsel %vm37_vm0, %v36_v22, 0.0 }
   0xd   :  { %v58_v30 = vmul.f32 0.33333334, %v42_v23  ;;  %v52_v31 = vadd.f32 %v51_v19, %v50_v24  ;;  %v59_v32 = vmul.f32 0.33333334, %v47_v27 }
   0xe   :  { %v57_v33 = vadd.f32 %v56_v29, %v55_v28 }
   0xf   :  { %v62_v34 = vpack.c.bf16 %v58_v30, %v58_v30  ;;  %v60_v35 = vmul.f32 0.33333334, %v52_v31  ;;  %v63_v36 = vpack.c.bf16 %v59_v32, %v59_v32 }
  0x10   :  { %v61_v37 = vmul.f32 0.33333334, %v57_v33 }
  0x11   :  { %67 = vst.msk [vmem:[#allocation5] sm:$0xf] %vm66_vm1, %v62_v34  ;;  %v64_v38 = vpack.c.bf16 %v60_v35, %v60_v35 }
  0x12   :  { %68 = vst.msk [vmem:[#allocation5 + $0x4] sm:$0xf] %vm66_vm1, %v63_v36  ;;  %v65_v39 = vpack.c.bf16 %v61_v37, %v61_v37 }
  0x13   :  { %69 = vst.msk [vmem:[#allocation5 + $0x8] sm:$0xf] %vm66_vm1, %v64_v38 }
  0x14   :  { %70 = vst.msk [vmem:[#allocation5 + $0xc] sm:$0xf] %vm66_vm1, %v65_v39 }
  0x15   :  { %83 = dma.vmem_to_hbm [thread:$0]  %s76_s13, 256, %s78_s16, [#allocation4], %s152_s17, %s152_s17, %s153_s18  }
  0x16   :  { %146 = dma.done.wait [#allocation4], 256  }
  0x17   :  { %147 = vsyncadd [#allocation4], 4294967040 }
  0x18   :  { %88 = vsyncpa [#allocation3], 1 }
  0x19   :  { %89 = vsyncpa [#allocation4], 1 }

</bundles_post_ra>
